<compile_context>
chip_gen: v5e
topology: v5e:2x2
jax: 0.10.0
libtpu: 0.0.40
codegen_flags: <defaults>
</compile_context>

<pallas_src>
import jax
import jax.numpy as jnp
from jax.experimental import pallas as pl
from jax.experimental.pallas import tpu as pltpu


def basic_block_kernel(x_pad_ref, x_id_ref, w1_ref, s1_ref, b1_ref,
                       w2_ref, s2_ref, b2_ref, out_ref):
    _, H, WC = out_ref.shape            # (1, H, W*C)   lane-dense output
    WpC = x_pad_ref.shape[2]            # (W+2)*C

    x_pad = x_pad_ref[0]                # (H+2, (W+2)*C), already zero padded

    # ---- conv1: 3 banded MXU matmuls over the kh taps, then bn1 + relu ----
    acc1 = jnp.dot(x_pad[0:H, :], w1_ref[0], preferred_element_type=jnp.float32)
    acc1 = acc1 + jnp.dot(x_pad[1:H + 1, :], w1_ref[1],
                          preferred_element_type=jnp.float32)
    acc1 = acc1 + jnp.dot(x_pad[2:H + 2, :], w1_ref[2],
                          preferred_element_type=jnp.float32)
    # bn1 folded (scale/shift are zero on the column halo, so the halo stays 0)
    mid = jnp.maximum(acc1 * s1_ref[...] + b1_ref[...], 0.0)   # (H, (W+2)*C)

    # Row-pad the intermediate in registers (top/bottom zero rows only; the
    # left/right column halo is already zero by construction of w1/bn1).
    zrow = jnp.zeros((1, WpC), jnp.float32)
    mid_pad = jnp.concatenate([zrow, mid, zrow], axis=0)       # (H+2, (W+2)*C)

    # ---- conv2: 3 banded MXU matmuls, then bn2 + residual + relu ----------
    acc2 = jnp.dot(mid, w2_ref[1], preferred_element_type=jnp.float32)
    acc2 = acc2 + jnp.dot(mid_pad[0:H, :], w2_ref[0],
                          preferred_element_type=jnp.float32)
    acc2 = acc2 + jnp.dot(mid_pad[2:H + 2, :], w2_ref[2],
                          preferred_element_type=jnp.float32)

    out = acc2 * s2_ref[...] + b2_ref[...] + x_id_ref[0]       # bn2 + identity
    out_ref[0] = jnp.maximum(out, 0.0).astype(out_ref.dtype)   # lane-dense store


def _banded_conv_weights(w_oihw, W, pad_out):
    """Express a 3x3 (stride 1, pad 1) conv over the lane-dense (w, c) axis as
    three banded matrices:  out_rows = sum_kh in_rows[kh:kh+H, :] @ big[kh].

    big[kh] has shape ((W+2)*Cin, Wout*Cout) with
      big[kh][w_in*Cin + ci, w_out*Cout + co] = w[kh, kw, ci, co],
      kw = w_in - (w_out - off)  (off=1 if the output keeps the column halo).
    If pad_out, halo output columns (w_out in {0, W+1}) are all-zero.
    """
    Cout, Cin, KH, KW = w_oihw.shape
    Wp = W + 2
    Wout = Wp if pad_out else W
    off = 1 if pad_out else 0

    w = jnp.transpose(w_oihw.astype(jnp.float32), (2, 3, 1, 0))   # (kh,kw,ci,co)
    w_in = jnp.arange(Wp)[:, None]                                # (Wp, 1)
    w_out = jnp.arange(Wout)[None, :]                             # (1, Wout)
    kw = w_in - (w_out - off)                                     # (Wp, Wout)
    valid = (kw >= 0) & (kw < KW)
    if pad_out:
        valid = valid & (w_out >= 1) & (w_out <= W)
    kw_c = jnp.clip(kw, 0, KW - 1)

    big = w[:, kw_c, :, :]                                        # (KH,Wp,Wout,Ci,Co)
    big = big * valid[None, :, :, None, None].astype(jnp.float32)
    big = jnp.transpose(big, (0, 1, 3, 2, 4))                     # (KH,Wp,Ci,Wout,Co)
    return big.reshape(KH, Wp * Cin, Wout * Cout)


def basic_block(x_nchw, w1, bn1, w2, bn2, eps=1e-5):
    # TODO(synk): stride>1 / downsample submodule not implemented (this block
    # instance is constructed with stride=1, downsample=None, Cin == Cout).
    N, C, H, W = x_nchw.shape
    Wp = W + 2
    WpC, WC = Wp * C, W * C

    x_nhwc = jnp.transpose(x_nchw, (0, 2, 3, 1)).astype(jnp.float32)  # NHWC
    x_id = x_nhwc.reshape(N, H, WC)                                   # lane-dense identity
    x_pad = jnp.pad(x_nhwc, ((0, 0), (1, 1), (1, 1), (0, 0)))         # SAME padding in XLA
    x_pad = x_pad.reshape(N, H + 2, WpC)                              # lane-dense rows

    def fold(bn):
        gamma, beta, mean, var = (a.astype(jnp.float32) for a in bn)
        scale = gamma / jnp.sqrt(var + eps)
        shift = beta - mean * scale
        return scale, shift

    s1, b1 = fold(bn1)
    s2, b2 = fold(bn2)

    # Broadcast per-channel BN params over the lane-dense (w, c) minor dim.
    # conv1's output keeps the zero column halo -> zero its params there too.
    interior = ((jnp.arange(Wp) >= 1) & (jnp.arange(Wp) <= W)).astype(jnp.float32)
    halo_mask = jnp.repeat(interior, C)                               # (Wp*C,)
    s1_row = (jnp.tile(s1, Wp) * halo_mask).reshape(1, WpC)
    b1_row = (jnp.tile(b1, Wp) * halo_mask).reshape(1, WpC)
    s2_row = jnp.tile(s2, W).reshape(1, WC)
    b2_row = jnp.tile(b2, W).reshape(1, WC)

    w1_big = _banded_conv_weights(w1, W, pad_out=True)    # (3, Wp*C, Wp*C)
    w2_big = _banded_conv_weights(w2, W, pad_out=False)   # (3, Wp*C, W*C)

    flops = 2 * N * H * (3 * WpC * WpC + 3 * WpC * WC)
    bytes_accessed = 4 * (x_pad.size + x_id.size + w1_big.size + w2_big.size
                          + 2 * WpC + 2 * WC + N * H * WC)

    out = pl.pallas_call(
        basic_block_kernel,
        out_shape=jax.ShapeDtypeStruct((N, H, WC), jnp.float32),
        grid_spec=pltpu.PrefetchScalarGridSpec(
            num_scalar_prefetch=0,
            grid=(N,),
            in_specs=[
                pl.BlockSpec((1, H + 2, WpC), lambda n: (n, 0, 0)),   # padded x
                pl.BlockSpec((1, H, WC), lambda n: (n, 0, 0)),        # identity
                pl.BlockSpec((3, WpC, WpC), lambda n: (0, 0, 0)),     # conv1 banded W
                pl.BlockSpec((1, WpC), lambda n: (0, 0)),             # bn1 scale
                pl.BlockSpec((1, WpC), lambda n: (0, 0)),             # bn1 shift
                pl.BlockSpec((3, WpC, WC), lambda n: (0, 0, 0)),      # conv2 banded W
                pl.BlockSpec((1, WC), lambda n: (0, 0)),              # bn2 scale
                pl.BlockSpec((1, WC), lambda n: (0, 0)),              # bn2 shift
            ],
            out_specs=pl.BlockSpec((1, H, WC), lambda n: (n, 0, 0)),
        ),
        compiler_params=pltpu.CompilerParams(
            dimension_semantics=("parallel",)),
        cost_estimate=pl.CostEstimate(
            flops=flops, transcendentals=0, bytes_accessed=bytes_accessed),
    )(x_pad, x_id, w1_big, s1_row, b1_row, w2_big, s2_row, b2_row)

    out = out.reshape(N, H, W, C)
    return jnp.transpose(out, (0, 3, 1, 2))                # back to NCHW


def basic_block_reference(x_nchw, w1, bn1, w2, bn2, eps=1e-5):
    """Pure-JAX reference (NCHW, matches PyTorch eval-mode BasicBlock)."""
    def conv(x, w):
        return jax.lax.conv_general_dilated(
            x, w, window_strides=(1, 1), padding="SAME",
            dimension_numbers=("NCHW", "OIHW", "NCHW"))

    def bn(x, p):
        g, b, m, v = (a[None, :, None, None] for a in p)
        return (x - m) / jnp.sqrt(v + eps) * g + b

    out = jnp.maximum(bn(conv(x_nchw, w1), bn1), 0.0)
    out = bn(conv(out, w2), bn2) + x_nchw
    return jnp.maximum(out, 0.0)


if __name__ == "__main__":
    N, C, H, W = 2, 8, 16, 16          # in_channel == out_channel, stride=1
    key = jax.random.PRNGKey(0)
    kx, kw1, kw2, kg1, kb1, kg2, kb2, km1, kv1, km2, kv2 = jax.random.split(key, 11)

    x = jax.random.normal(kx, (N, C, H, W), jnp.float32)
    w1 = jax.random.normal(kw1, (C, C, 3, 3), jnp.float32) * 0.1
    w2 = jax.random.normal(kw2, (C, C, 3, 3), jnp.float32) * 0.1

    bn1 = (1.0 + 0.1 * jax.random.normal(kg1, (C,), jnp.float32),   # gamma
           0.1 * jax.random.normal(kb1, (C,), jnp.float32),         # beta
           0.1 * jax.random.normal(km1, (C,), jnp.float32),         # running_mean
           1.0 + 0.1 * jax.nn.softplus(jax.random.normal(kv1, (C,), jnp.float32)))  # running_var
    bn2 = (1.0 + 0.1 * jax.random.normal(kg2, (C,), jnp.float32),
           0.1 * jax.random.normal(kb2, (C,), jnp.float32),
           0.1 * jax.random.normal(km2, (C,), jnp.float32),
           1.0 + 0.1 * jax.nn.softplus(jax.random.normal(kv2, (C,), jnp.float32)))

    out = jax.block_until_ready(basic_block(x, w1, bn1, w2, bn2))
    ref = jax.block_until_ready(basic_block_reference(x, w1, bn1, w2, bn2))

    assert out.shape == (N, C, H, W), out.shape
    assert jnp.allclose(out, ref, atol=1e-4, rtol=1e-4), \
        float(jnp.max(jnp.abs(out - ref)))
    print("KERNEL_OK")
</pallas_src>

<mosaic_0001>
module attributes {stable_mosaic.version = 11 : i64} {
  func.func @basic_block_kernel(%arg0: i32, %arg1: memref<1x18x144xf32, #tpu.memory_space<vmem>>, %arg2: memref<1x16x128xf32, #tpu.memory_space<vmem>>, %arg3: memref<3x144x144xf32, #tpu.memory_space<vmem>>, %arg4: memref<1x144xf32, #tpu.memory_space<vmem>>, %arg5: memref<1x144xf32, #tpu.memory_space<vmem>>, %arg6: memref<3x144x128xf32, #tpu.memory_space<vmem>>, %arg7: memref<1x128xf32, #tpu.memory_space<vmem>>, %arg8: memref<1x128xf32, #tpu.memory_space<vmem>>, %arg9: memref<1x16x128xf32, #tpu.memory_space<vmem>>) attributes {dimension_semantics = [#tpu.dimension_semantics<parallel>], iteration_bounds = array<i64: 2>, scalar_prefetch = 0 : i64, scratch_operands = 0 : i64, tpu.core_type = #tpu.core_type<tc>, window_params = [{transform_indices = @transform_0, window_bounds = array<i64: 1, 18, 144>}, {transform_indices = @transform_1, window_bounds = array<i64: 1, 16, 128>}, {pipeline_mode = #tpu.pipeline_mode<synchronous>, transform_indices = @transform_2, window_bounds = array<i64: 3, 144, 144>}, {pipeline_mode = #tpu.pipeline_mode<synchronous>, transform_indices = @transform_3, window_bounds = array<i64: 1, 144>}, {pipeline_mode = #tpu.pipeline_mode<synchronous>, transform_indices = @transform_4, window_bounds = array<i64: 1, 144>}, {pipeline_mode = #tpu.pipeline_mode<synchronous>, transform_indices = @transform_5, window_bounds = array<i64: 3, 144, 128>}, {pipeline_mode = #tpu.pipeline_mode<synchronous>, transform_indices = @transform_6, window_bounds = array<i64: 1, 128>}, {pipeline_mode = #tpu.pipeline_mode<synchronous>, transform_indices = @transform_7, window_bounds = array<i64: 1, 128>}, {transform_indices = @transform_8, window_bounds = array<i64: 1, 16, 128>}]} {
    %c0 = arith.constant 0 : index
    %c0_0 = arith.constant 0 : index
    %c0_1 = arith.constant 0 : index
    %0 = vector.load %arg1[%c0, %c0_0, %c0_1] : memref<1x18x144xf32, #tpu.memory_space<vmem>>, vector<1x18x144xf32>
    %1 = vector.shape_cast %0 : vector<1x18x144xf32> to vector<18x144xf32>
    %2 = vector.extract_strided_slice %1 {offsets = [0, 0], sizes = [16, 144], strides = [1, 1]} : vector<18x144xf32> to vector<16x144xf32>
    %c0_2 = arith.constant 0 : index
    %c0_3 = arith.constant 0 : index
    %c0_4 = arith.constant 0 : index
    %3 = vector.load %arg3[%c0_2, %c0_3, %c0_4] : memref<3x144x144xf32, #tpu.memory_space<vmem>>, vector<1x144x144xf32>
    %4 = vector.shape_cast %3 : vector<1x144x144xf32> to vector<144x144xf32>
    %cst = arith.constant dense<0.000000e+00> : vector<16x144xf32>
    %5 = tpu.matmul %2, %4, %cst {dimension_numbers = #tpu.dot_dimension_numbers<[1], [0], [0], [1], [0, 0, 1, 1], [], []>} : vector<16x144xf32>, vector<144x144xf32>, vector<16x144xf32> -> vector<16x144xf32>
    %6 = vector.extract_strided_slice %1 {offsets = [1, 0], sizes = [16, 144], strides = [1, 1]} : vector<18x144xf32> to vector<16x144xf32>
    %c1 = arith.constant 1 : index
    %c0_5 = arith.constant 0 : index
    %c0_6 = arith.constant 0 : index
    %7 = vector.load %arg3[%c1, %c0_5, %c0_6] : memref<3x144x144xf32, #tpu.memory_space<vmem>>, vector<1x144x144xf32>
    %8 = vector.shape_cast %7 : vector<1x144x144xf32> to vector<144x144xf32>
    %cst_7 = arith.constant dense<0.000000e+00> : vector<16x144xf32>
    %9 = tpu.matmul %6, %8, %cst_7 {dimension_numbers = #tpu.dot_dimension_numbers<[1], [0], [0], [1], [0, 0, 1, 1], [], []>} : vector<16x144xf32>, vector<144x144xf32>, vector<16x144xf32> -> vector<16x144xf32>
    %10 = arith.addf %5, %9 : vector<16x144xf32>
    %11 = vector.extract_strided_slice %1 {offsets = [2, 0], sizes = [16, 144], strides = [1, 1]} : vector<18x144xf32> to vector<16x144xf32>
    %c2 = arith.constant 2 : index
    %c0_8 = arith.constant 0 : index
    %c0_9 = arith.constant 0 : index
    %12 = vector.load %arg3[%c2, %c0_8, %c0_9] : memref<3x144x144xf32, #tpu.memory_space<vmem>>, vector<1x144x144xf32>
    %13 = vector.shape_cast %12 : vector<1x144x144xf32> to vector<144x144xf32>
    %cst_10 = arith.constant dense<0.000000e+00> : vector<16x144xf32>
    %14 = tpu.matmul %11, %13, %cst_10 {dimension_numbers = #tpu.dot_dimension_numbers<[1], [0], [0], [1], [0, 0, 1, 1], [], []>} : vector<16x144xf32>, vector<144x144xf32>, vector<16x144xf32> -> vector<16x144xf32>
    %15 = arith.addf %10, %14 : vector<16x144xf32>
    %c0_11 = arith.constant 0 : index
    %c0_12 = arith.constant 0 : index
    %16 = vector.load %arg4[%c0_11, %c0_12] : memref<1x144xf32, #tpu.memory_space<vmem>>, vector<1x144xf32>
    %17 = vector.broadcast %16 : vector<1x144xf32> to vector<16x144xf32>
    %18 = arith.mulf %15, %17 : vector<16x144xf32>
    %c0_13 = arith.constant 0 : index
    %c0_14 = arith.constant 0 : index
    %19 = vector.load %arg5[%c0_13, %c0_14] : memref<1x144xf32, #tpu.memory_space<vmem>>, vector<1x144xf32>
    %20 = vector.broadcast %19 : vector<1x144xf32> to vector<16x144xf32>
    %21 = arith.addf %18, %20 : vector<16x144xf32>
    %cst_15 = arith.constant 0.000000e+00 : f32
    %22 = vector.broadcast %cst_15 : f32 to vector<16x144xf32>
    %23 = arith.maximumf %21, %22 : vector<16x144xf32>
    %cst_16 = arith.constant 0.000000e+00 : f32
    %24 = vector.broadcast %cst_16 : f32 to vector<1x144xf32>
    %25 = tpu.concatenate %24, %23, %24 in 0 : vector<1x144xf32>, vector<16x144xf32>, vector<1x144xf32> -> vector<18x144xf32>
    %c1_17 = arith.constant 1 : index
    %c0_18 = arith.constant 0 : index
    %c0_19 = arith.constant 0 : index
    %26 = vector.load %arg6[%c1_17, %c0_18, %c0_19] : memref<3x144x128xf32, #tpu.memory_space<vmem>>, vector<1x144x128xf32>
    %27 = vector.shape_cast %26 : vector<1x144x128xf32> to vector<144x128xf32>
    %cst_20 = arith.constant dense<0.000000e+00> : vector<16x128xf32>
    %28 = tpu.matmul %23, %27, %cst_20 {dimension_numbers = #tpu.dot_dimension_numbers<[1], [0], [0], [1], [0, 0, 1, 1], [], []>} : vector<16x144xf32>, vector<144x128xf32>, vector<16x128xf32> -> vector<16x128xf32>
    %29 = vector.extract_strided_slice %25 {offsets = [0, 0], sizes = [16, 144], strides = [1, 1]} : vector<18x144xf32> to vector<16x144xf32>
    %c0_21 = arith.constant 0 : index
    %c0_22 = arith.constant 0 : index
    %c0_23 = arith.constant 0 : index
    %30 = vector.load %arg6[%c0_21, %c0_22, %c0_23] : memref<3x144x128xf32, #tpu.memory_space<vmem>>, vector<1x144x128xf32>
    %31 = vector.shape_cast %30 : vector<1x144x128xf32> to vector<144x128xf32>
    %cst_24 = arith.constant dense<0.000000e+00> : vector<16x128xf32>
    %32 = tpu.matmul %29, %31, %cst_24 {dimension_numbers = #tpu.dot_dimension_numbers<[1], [0], [0], [1], [0, 0, 1, 1], [], []>} : vector<16x144xf32>, vector<144x128xf32>, vector<16x128xf32> -> vector<16x128xf32>
    %33 = arith.addf %28, %32 : vector<16x128xf32>
    %34 = vector.extract_strided_slice %25 {offsets = [2, 0], sizes = [16, 144], strides = [1, 1]} : vector<18x144xf32> to vector<16x144xf32>
    %c2_25 = arith.constant 2 : index
    %c0_26 = arith.constant 0 : index
    %c0_27 = arith.constant 0 : index
    %35 = vector.load %arg6[%c2_25, %c0_26, %c0_27] : memref<3x144x128xf32, #tpu.memory_space<vmem>>, vector<1x144x128xf32>
    %36 = vector.shape_cast %35 : vector<1x144x128xf32> to vector<144x128xf32>
    %cst_28 = arith.constant dense<0.000000e+00> : vector<16x128xf32>
    %37 = tpu.matmul %34, %36, %cst_28 {dimension_numbers = #tpu.dot_dimension_numbers<[1], [0], [0], [1], [0, 0, 1, 1], [], []>} : vector<16x144xf32>, vector<144x128xf32>, vector<16x128xf32> -> vector<16x128xf32>
    %38 = arith.addf %33, %37 : vector<16x128xf32>
    %c0_29 = arith.constant 0 : index
    %c0_30 = arith.constant 0 : index
    %39 = vector.load %arg7[%c0_29, %c0_30] : memref<1x128xf32, #tpu.memory_space<vmem>>, vector<1x128xf32>
    %40 = vector.broadcast %39 : vector<1x128xf32> to vector<16x128xf32>
    %41 = arith.mulf %38, %40 : vector<16x128xf32>
    %c0_31 = arith.constant 0 : index
    %c0_32 = arith.constant 0 : index
    %42 = vector.load %arg8[%c0_31, %c0_32] : memref<1x128xf32, #tpu.memory_space<vmem>>, vector<1x128xf32>
    %43 = vector.broadcast %42 : vector<1x128xf32> to vector<16x128xf32>
    %44 = arith.addf %41, %43 : vector<16x128xf32>
    %c0_33 = arith.constant 0 : index
    %c0_34 = arith.constant 0 : index
    %c0_35 = arith.constant 0 : index
    %45 = vector.load %arg2[%c0_33, %c0_34, %c0_35] : memref<1x16x128xf32, #tpu.memory_space<vmem>>, vector<1x16x128xf32>
    %46 = vector.shape_cast %45 : vector<1x16x128xf32> to vector<16x128xf32>
    %47 = arith.addf %44, %46 : vector<16x128xf32>
    %cst_36 = arith.constant 0.000000e+00 : f32
    %48 = vector.broadcast %cst_36 : f32 to vector<16x128xf32>
    %49 = arith.maximumf %47, %48 : vector<16x128xf32>
    %c0_37 = arith.constant 0 : index
    %c0_38 = arith.constant 0 : index
    %c0_39 = arith.constant 0 : index
    %50 = vector.load %arg9[%c0_37, %c0_38, %c0_39] : memref<1x16x128xf32, #tpu.memory_space<vmem>>, vector<1x16x128xf32>
    %51 = vector.shape_cast %50 : vector<1x16x128xf32> to vector<16x128xf32>
    %52 = vector.shape_cast %49 : vector<16x128xf32> to vector<1x16x128xf32>
    tpu.vector_store %arg9[%c0_37, %c0_38, %c0_39], %52 {strides = array<i32>} : memref<1x16x128xf32, #tpu.memory_space<vmem>>, vector<1x16x128xf32>,
    return
  }
  func.func @transform_0(%arg0: i32) -> (i32, i32, i32) {
    %c0_i32 = arith.constant 0 : i32
    %c0_i32_0 = arith.constant 0 : i32
    %c0_i32_1 = arith.constant 0 : i32
    return %arg0, %c0_i32, %c0_i32_0 : i32, i32, i32
  }
  func.func @transform_1(%arg0: i32) -> (i32, i32, i32) {
    %c0_i32 = arith.constant 0 : i32
    %c0_i32_0 = arith.constant 0 : i32
    %c0_i32_1 = arith.constant 0 : i32
    return %arg0, %c0_i32, %c0_i32_0 : i32, i32, i32
  }
  func.func @transform_2(%arg0: i32) -> (i32, i32, i32) {
    %c0_i32 = arith.constant 0 : i32
    %c0_i32_0 = arith.constant 0 : i32
    %c0_i32_1 = arith.constant 0 : i32
    %c0_i32_2 = arith.constant 0 : i32
    return %c0_i32, %c0_i32_0, %c0_i32_1 : i32, i32, i32
  }
  func.func @transform_3(%arg0: i32) -> (i32, i32) {
    %c0_i32 = arith.constant 0 : i32
    %c0_i32_0 = arith.constant 0 : i32
    %c0_i32_1 = arith.constant 0 : i32
    return %c0_i32, %c0_i32_0 : i32, i32
  }
  func.func @transform_4(%arg0: i32) -> (i32, i32) {
    %c0_i32 = arith.constant 0 : i32
    %c0_i32_0 = arith.constant 0 : i32
    %c0_i32_1 = arith.constant 0 : i32
    return %c0_i32, %c0_i32_0 : i32, i32
  }
  func.func @transform_5(%arg0: i32) -> (i32, i32, i32) {
    %c0_i32 = arith.constant 0 : i32
    %c0_i32_0 = arith.constant 0 : i32
    %c0_i32_1 = arith.constant 0 : i32
    %c0_i32_2 = arith.constant 0 : i32
    return %c0_i32, %c0_i32_0, %c0_i32_1 : i32, i32, i32
  }
  func.func @transform_6(%arg0: i32) -> (i32, i32) {
    %c0_i32 = arith.constant 0 : i32
    %c0_i32_0 = arith.constant 0 : i32
    %c0_i32_1 = arith.constant 0 : i32
    return %c0_i32, %c0_i32_0 : i32, i32
  }
  func.func @transform_7(%arg0: i32) -> (i32, i32) {
    %c0_i32 = arith.constant 0 : i32
    %c0_i32_0 = arith.constant 0 : i32
    %c0_i32_1 = arith.constant 0 : i32
    return %c0_i32, %c0_i32_0 : i32, i32
  }
  func.func @transform_8(%arg0: i32) -> (i32, i32, i32) {
    %c0_i32 = arith.constant 0 : i32
    %c0_i32_0 = arith.constant 0 : i32
    %c0_i32_1 = arith.constant 0 : i32
    return %arg0, %c0_i32, %c0_i32_0 : i32, i32, i32
  }
}

</mosaic_0001>

<bundles_post_ra>
// kernel: tpu_custom_call.1
= control target key start
LH: loop header
LB: loop body
LE: loop exit
PB: predicated region body
PF: predicated region fallthrough
CT: control target
= control target key end

     0   :  { %13 = vsyncpa [#allocation3], 0  ;;  %s1729_s0 = inlined_call_operand.vmem [shape: f32[2,18,144], index: 0, kind: input, shape index: {}]   ;;  %s1730_s1 = inlined_call_operand.vmem [shape: f32[2,16,128], index: 1, kind: input, shape index: {}]   ;;  %s1731_s2 = inlined_call_operand.hbm [shape: f32[3,144,144], index: 2, kind: input, shape index: {}]   ;;  %s1732_s3 = inlined_call_operand.vmem [shape: f32[1,144], index: 3, kind: input, shape index: {}]   ;;  %s1733_s4 = inlined_call_operand.vmem [shape: f32[1,144], index: 4, kind: input, shape index: {}]   ;;  %s1734_s5 = inlined_call_operand.hbm [shape: f32[3,144,128], index: 5, kind: input, shape index: {}]   ;;  %s1735_s6 = inlined_call_operand.vmem [shape: f32[1,128], index: 6, kind: input, shape index: {}]   ;;  %s1736_s7 = inlined_call_operand.vmem [shape: f32[1,128], index: 7, kind: input, shape index: {}]   ;;  %s1737_s8 = inlined_call_operand.hbm [shape: f32[2,16,128], index: 8, kind: output, shape index: {}]  }
   0x1   :  { %14 = vsyncpa [#allocation6], 0 }
   0x2   :  { %15 = vsyncpa [#allocation4], 0 }
   0x3   :  { %17 = vsyncpa [#allocation4 + $0x1], 0  ;;  %s1492_s27 = smov 0   ;;  %s1494_s28 = smov 0  }
   0x4   :  { %s1496_s29 = smov 0   ;;  %s1498_s30 = smov 0  }
   0x5 LB: > { %s1513_s9 = sadd.s32 4294967295, %s1437_s30   ;;  %s1199_s10 = sadd.s32 4294967294, %s1437_s30   ;;  %s1437_s30 = sphi %s1498_s30, %s1744_s30   ;;  %s1433_s29 = sphi %s1496_s29, %s1743_s29   ;;  %s1429_s28 = sphi %s1494_s28, %s1742_s28   ;;  %s1425_s27 = sphi %s1492_s27, %s1741_s27  }
   0x6   : > { %s1517_s11 = sadd.s32 1, %s1437_s30   ;;  %s208_s12 = sadd.s32 1, %s1433_s29 }
   0x7   : > { %s205_s13 = ssub.s32 %s1437_s30, %s1517_s11  ;;  %p218_p0 = scmp.ne.s32.totalorder %s1433_s29, %s1429_s28 }
   0x8   : > { %p206_p1 = scmp.eq.s32.totalorder %s205_s13, 0  ;;  %p219_p2 = scmp.eq.s32.totalorder %s1513_s9, 1 }
   0x9   : > { %p224_p3 = scmp.ne.s32.totalorder %s1429_s28, %s1425_s27  ;;  %p225_p4 = scmp.eq.s32.totalorder %s1199_s10, 1 }
   0xa   : > { %s1528_s14 = scalar_select %p206_p1, %s1433_s29, %s208_s12  }
   0xb   : > { %p1530_p5 = por %p219_p2, %p218_p0  ;;  %p1534_p6 = por %p225_p4, %p224_p3 }
   0xc   : > { %p1200_p7 = scmp.ge.s32.totalorder %s1437_s30, 1  ;;  %p232_p8 = scmp.lt.s32.totalorder %s1437_s30, 3 }
   0xd   : > { %p1260_p9 = scmp.eq.s32.totalorder %s1513_s9, 0  ;;  %s243_s20 = sshll.u32 %s1731_s2, 4  ;;  %s244_s20 = int_to_ptr.hbm [resolvable:$true] %s243_s20 }
   0xe   : > { %p1541_p10 = pnand %p1200_p7, %p232_p8  ;;  %s1439_s21 = smov [#allocation2]  }
   0xf   : > { %s245_s22 = sshll.u32 %s1439_s21, 4  ;;  %s263_s25 = sshll.u32 %s1734_s5, 4  ;;  %s246_s22 = int_to_ptr.vmem [resolvable:$true] %s245_s22  ;;  %s264_s25 = int_to_ptr.hbm [resolvable:$true] %s263_s25 }
  0x10   : > { %p1249_p11 = pneg %p1541_p10  ;;  %s1440_s26 = smov 256  }
  0x11   : > { %s1441_s10 = smov 16   ;;  %s1442_s12 = smov [#allocation5]  }
  0x12   : > { %p1250_p12 = pnand %p1260_p9, %p1249_p11  ;;  %s265_s13 = sshll.u32 %s1442_s12, 4  ;;  %s266_s13 = int_to_ptr.vmem [resolvable:$true] %s265_s13 }
  0x13   : > { %s1443_s18 = smov 128   ;;  %s1444_s19 = smov 8  }
  0x14   : > { %1252 = dma.hbm_to_vmem [thread:$0]  (!%p1250_p12), %s244_s20, 13824, %s246_s22, [#allocation3], %s1440_s26, %s1440_s26, %s1441_s10  }
  0x15   : > { %1255 = dma.hbm_to_vmem [thread:$0]  (!%p1250_p12), %s264_s25, 6912, %s266_s13, [#allocation6], %s1443_s18, %s1443_s18, %s1444_s19  }
  0x16   : > { %303 = sbr.rel (%p1541_p10) target bundleno = 417 (0x1a1), region = 52 }
  0x1b   : > { %1412 = dma.done.wait (%p1260_p9), [#allocation3], 13824  }
  0x1c   : > { %1414 = vsyncadd (%p1260_p9), [#allocation3], 4294953472 }
  0x1d   : > { %1416 = dma.done.wait (%p1260_p9), [#allocation6], 6912  }
  0x1e   : > { %1418 = vsyncadd (%p1260_p9), [#allocation6], 4294960384  ;;  %p348_p13 = scmp.lt.s32.totalorder %s1513_s9, 1  ;;  %v431_v0 = vld [vmem:[#allocation2 + $0x210] sm:$0xff]  ;;  %v432_v2 = vld [vmem:[#allocation2 + $0x218] sm:$0xff]  ;;  %vm443_vm0 = vcmask 1046528  }
  0x1f   : > { %v435_v1 = vld [vmem:[#allocation2 + $0x230] sm:$0xff]  ;;  %461 = vmatpush.msra.mxu0 %v431_v0  ;;  %v436_v3 = vld [vmem:[#allocation2 + $0x238] sm:$0xff]  ;;  %v429_v4 = vld [vmem:[#allocation2 + $0x200] sm:$0xff]  ;;  %507 = vmatpush.msra.mxu2 %v432_v2  ;;  %vm456_vm1 = vcmask 130048   ;;  %vm686_vm2 = vcmask 1045504   ;;  %vm827_vm3 = vcmask 1040384  }
  0x20   : > { %s1567_s20 = scalar_select %p348_p13, %s1513_s9, 1  ;;  %498 = vmatpush.msra.mxu1 %v435_v1  ;;  %v433_v5 = vld [vmem:[#allocation2 + $0x220] sm:$0xff]  ;;  %544 = vmatpush.msra.mxu3 %v436_v3  ;;  %v430_v6 = vld [vmem:[#allocation2 + $0x208] sm:$0xff]  ;;  %v394_v8 = vld [vmem:[#allocation2 + $0xf0] sm:$0xff] }
  0x21   : > { %v434_v7 = vld [vmem:[#allocation2 + $0x228] sm:$0xff]  ;;  %462 = vmatpush.msra.mxu0 %v429_v4  ;;  %v398_v9 = vld [vmem:[#allocation2 + $0x110] sm:$0xff]  ;;  %v428_v11 = vld [vmem:[#allocation2 + $0x1f8] sm:$0xff]  ;;  %508 = vmatpush.msra.mxu2 %v430_v6  ;;  %s1237_s25 = sshll.u32 %s1513_s9, 4 }
  0x22   : > { %s1238_s17 = smul.u32 48, %s1567_s20  ;;  %499 = vmatpush.msra.mxu1 %v433_v5  ;;  %v427_v10 = vld [vmem:[#allocation2 + $0x1f0] sm:$0xff]  ;;  %545 = vmatpush.msra.mxu3 %v434_v7  ;;  %v392_v14 = vld [vmem:[#allocation2 + $0xe0] sm:$0xff]  ;;  %v426_v19 = vld [vmem:[#allocation2 + $0x1e8] sm:$0xff]  ;;  %s1236_s12 = sshll.u32 %s1567_s20, 4 }
  0x23   : > { %v396_v17 = vld [vmem:[#allocation2 + $0x100] sm:$0xff]  ;;  %463 = vmatpush.msra.mxu0 %v427_v10  ;;  %509 = vmatpush.msra.mxu2 %v428_v11  ;;  %v395_v20 = vld [vmem:[#allocation2 + $0xf8] sm:$0xff]  ;;  %v390_v22 = vld [vmem:[#allocation2 + $0xd0] sm:$0xff]  ;;  %s357_s21 = scalar_lea.vmem %s1730_s1, %s1236_s12  ;;  %s345_s20 = sand.u32 1, %s1429_s28  }
  0x24   : > { %s1573_s23 = scalar_lea.vmem %s1729_s0, %s1238_s17  ;;  %557 = vmatpush.msrb.mxu1 %v394_v8  ;;  %594 = vmatpush.msrb.mxu3 %v398_v9  ;;  %v425_v18 = vld [vmem:[#allocation2 + $0x1e0] sm:$0xff]  ;;  %v423_v23 = vld [vmem:[#allocation2 + $0x1d0] sm:$0xff]  ;;  %v424_v24 = vld [vmem:[#allocation2 + $0x1d8] sm:$0xff]  ;;  %s1207_s24 = sshll.u32 %s345_s20, 4 }
  0x25   : > { %v1576_v12 = vld [vmem:[%s1573_s23 + $0x8] sm:$0xff]  ;;  %v1579_v13 = vld [vmem:[%s1573_s23 + $0x18] sm:$0xff]  ;;  %464 = vmatpush.msra.mxu0 %v425_v18  ;;  %510 = vmatpush.msra.mxu2 %v426_v19  ;;  %v388_v26 = vld [vmem:[#allocation2 + $0xc0] sm:$0xff]  ;;  %s1099_s12 = scalar_lea.hbm %s1737_s8, %s1237_s25  ;;  %s347_s13 = scalar_lea.vmem [#allocation7], %s1207_s24 }
  0x26   : > { %v447_v15 = vrot.slane %v1576_v12, 1  ;;  %v448_v16 = vrot.slane %v1579_v13, 1  ;;  %558 = vmatpush.msrb.mxu1 %v392_v14  ;;  %595 = vmatpush.msrb.mxu3 %v396_v17  ;;  %v393_v25 = vld [vmem:[#allocation2 + $0xe8] sm:$0xff]  ;;  %v421_v27 = vld [vmem:[#allocation2 + $0x1c0] sm:$0xff]  ;;  %v391_v29 = vld [vmem:[#allocation2 + $0xd8] sm:$0xff]  ;;  %s1100_s18 = sshll.u32 %s347_s13, 4  ;;  %s1101_s18 = int_to_ptr.vmem [resolvable:$true] %s1100_s18 }
  0x27   : > { %465 = vmatpush.msra.mxu0 %v423_v23  ;;  %v422_v28 = vld [vmem:[#allocation2 + $0x1c8] sm:$0xff]  ;;  %511 = vmatpush.msra.mxu2 %v424_v24  ;;  %v386_v31 = vld [vmem:[#allocation2 + $0xb0] sm:$0xff]  ;;  %v420_v34 = vld [vmem:[#allocation2 + $0x1b8] sm:$0xff]  ;;  %s1102_s19 = sshll.u32 %s1099_s12, 4  ;;  %s1088_s9 = scalar_lea.sflag [#allocation4], %s345_s20  ;;  %s1103_s19 = int_to_ptr.hbm [resolvable:$true] %s1102_s19 }
  0x28   : > { %v449_v21 = vsel %vm443_vm0, %v447_v15, %v448_v16  ;;  %559 = vmatpush.msrb.mxu1 %v390_v22  ;;  %v1586_v30 = vld [vmem:[%s1573_s23 + $0x28] sm:$0x3]  ;;  %v419_v32 = vld [vmem:[#allocation2 + $0x1b0] sm:$0xff]  ;;  %v384_v37 = vld [vmem:[#allocation2 + $0xa0] sm:$0xff]  ;;  %s1381_s17 = sshra.s32 %s1103_s19, 4  ;;  %s1382_s17 = int_to_ptr.hbm [resolvable:$true] %s1381_s17 }
  0x29   : > { %1213 = vmatmul.msk.f32.vlgmr.msra.gmra.mxu3 %vm456_vm1, %v449_v21  ;;  %v452_v33 = vrot.slane %v1586_v30, 1  ;;  %466 = vmatpush.msra.mxu0 %v421_v27  ;;  %v389_v35 = vld [vmem:[#allocation2 + $0xc8] sm:$0xff]  ;;  %v417_v38 = vld [vmem:[#allocation2 + $0x1a0] sm:$0xff]  ;;  %v387_v40 = vld [vmem:[#allocation2 + $0xb8] sm:$0xff]  ;;  %s1383_s22 = scalar_lea.hbm %s1382_s17, 16  ;;  %p1388_p3 = scmp.lt.s32.totalorder %s1382_s17, %s1737_s8 }
  0x2a   : > { %603 = vmatpush.msra.mxu3 %v395_v20  ;;  %560 = vmatpush.msrb.mxu1 %v388_v26  ;;  %v418_v39 = vld [vmem:[#allocation2 + $0x1a8] sm:$0xff]  ;;  %v382_v41 = vld [vmem:[#allocation2 + $0x90] sm:$0xff]  ;;  %v416_v43 = vld [vmem:[#allocation2 + $0x198] sm:$0xff]  ;;  %p1384_p0 = scmp.ne.s32.totalorder %s1382_s17, %s1383_s22 }
  0x2b   : > { %512 = vmatpush.msra.mxu2 %v422_v28  ;;  %v1590_v36 = vsel %vm443_vm0, %v448_v16, %v452_v33  ;;  %467 = vmatpush.msra.mxu0 %v419_v32  ;;  %v415_v42 = vld [vmem:[#allocation2 + $0x190] sm:$0xff]  ;;  %v385_v44 = vld [vmem:[#allocation2 + $0xa8] sm:$0xff]  ;;  %v380_v45 = vld [vmem:[#allocation2 + $0x80] sm:$0xff] }
  0x2c   : > { %604 = vmatpush.msra.mxu3 %v393_v25  ;;  %561 = vmatpush.msrb.mxu1 %v386_v31  ;;  %v413_v46 = vld [vmem:[#allocation2 + $0x180] sm:$0xff]  ;;  %v414_v47 = vld [vmem:[#allocation2 + $0x188] sm:$0xff]  ;;  %v383_v48 = vld [vmem:[#allocation2 + $0x98] sm:$0xff]  ;;  %p1385_p1 = pnand %p1384_p0, %p1530_p5 }
  0x2d   : > { %513 = vmatpush.msra.mxu2 %v420_v34  ;;  %468 = vmatpush.msra.mxu0 %v417_v38  ;;  %v378_v49 = vld [vmem:[#allocation2 + $0x70] sm:$0xff]  ;;  %v412_v51 = vld [vmem:[#allocation2 + $0x178] sm:$0xff]  ;;  %v381_v52 = vld [vmem:[#allocation2 + $0x88] sm:$0xff] }
  0x2e   : > { %605 = vmatpush.msra.mxu3 %v391_v29  ;;  %562 = vmatpush.msrb.mxu1 %v384_v37  ;;  %v411_v50 = vld [vmem:[#allocation2 + $0x170] sm:$0xff]  ;;  %v376_v53 = vld [vmem:[#allocation2 + $0x60] sm:$0xff]  ;;  %v410_v55 = vld [vmem:[#allocation2 + $0x168] sm:$0xff]  ;;  %p1386_p2 = pneg %p1385_p1 }
  0x2f   : > { %514 = vmatpush.msra.mxu2 %v418_v39  ;;  %469 = vmatpush.msra.mxu0 %v415_v42  ;;  %v409_v54 = vld [vmem:[#allocation2 + $0x160] sm:$0xff]  ;;  %v379_v56 = vld [vmem:[#allocation2 + $0x78] sm:$0xff]  ;;  %v374_v57 = vld [vmem:[#allocation2 + $0x50] sm:$0xff] }
  0x30   : > { %606 = vmatpush.msra.mxu3 %v389_v35  ;;  %563 = vmatpush.msrb.mxu1 %v382_v41  ;;  %v407_v58 = vld [vmem:[#allocation2 + $0x150] sm:$0xff]  ;;  %v408_v59 = vld [vmem:[#allocation2 + $0x158] sm:$0xff]  ;;  %v377_v60 = vld [vmem:[#allocation2 + $0x68] sm:$0xff] }
  0x31   : > { %1214 = vmatmul.msk.f32.gmra.mxu3 %vm456_vm1, %v1590_v36  ;;  %515 = vmatpush.msra.mxu2 %v416_v43  ;;  %v372_v61 = vld [vmem:[#allocation2 + $0x40] sm:$0xff]  ;;  %v1601_v63 = vld [vmem:[%s1573_s23 + $0x10] sm:$0xff]  ;;  %v406_v1 = vld [vmem:[#allocation2 + $0x148] sm:$0xff] }
  0x32   : > { %607 = vmatpush.msra.mxu3 %v387_v40  ;;  %564 = vmatpush.msrb.mxu1 %v380_v45  ;;  %v1598_v62 = vld [vmem:[%s1573_s23] sm:$0xff]  ;;  %v375_v2 = vld [vmem:[#allocation2 + $0x58] sm:$0xff]  ;;  %v370_v3 = vld [vmem:[#allocation2 + $0x30] sm:$0xff]  ;;  %v445_v6 = vrot.slane %v1601_v63, 1  ;;  %v691_v45 = vrot.slane %v1579_v13, 2 }
  0x33   : > { %470 = vmatpush.msra.mxu0 %v413_v46  ;;  %1211 = vmatmul.msk.f32.vlgmr.msra.gmra.mxu1 %vm456_vm1, %v449_v21  ;;  %v405_v0 = vld [vmem:[#allocation2 + $0x140] sm:$0xff]  ;;  %v403_v4 = vld [vmem:[#allocation2 + $0x130] sm:$0xff]  ;;  %v444_v5 = vrot.slane %v1598_v62, 1  ;;  %v404_v7 = vld [vmem:[#allocation2 + $0x138] sm:$0xff] }
  0x34   : > { %608 = vmatpush.msra.mxu3 %v385_v44  ;;  %516 = vmatpush.msra.mxu2 %v414_v47  ;;  %v373_v8 = vld [vmem:[#allocation2 + $0x48] sm:$0xff]  ;;  %v368_v9 = vld [vmem:[#allocation2 + $0x20] sm:$0xff]  ;;  %v371_v14 = vld [vmem:[#allocation2 + $0x38] sm:$0xff]  ;;  %v690_v44 = vrot.slane %v1576_v12, 2 }
  0x35   : > { %565 = vmatpush.msrb.mxu1 %v378_v49  ;;  %471 = vmatpush.msra.mxu0 %v411_v50  ;;  %v401_v10 = vld [vmem:[#allocation2 + $0x120] sm:$0xff]  ;;  %v402_v11 = vld [vmem:[#allocation2 + $0x128] sm:$0xff]  ;;  %v446_v15 = vsel %vm443_vm0, %v444_v5, %v445_v6  ;;  %v366_v16 = vld [vmem:[#allocation2 + $0x10] sm:$0xff] }
  0x36   : > { %609 = vmatpush.msra.mxu3 %v383_v48  ;;  %517 = vmatpush.msra.mxu2 %v412_v51  ;;  %v680_v17 = vld [vmem:[#allocation2 + $0x330] sm:$0xff]  ;;  %v369_v18 = vld [vmem:[#allocation2 + $0x28] sm:$0xff]  ;;  %v1611_v19 = vld [vmem:[%s1573_s23 + $0x20] sm:$0x3]  ;;  %v692_v50 = vsel %vm686_vm2, %v690_v44, %v691_v45 }
  0x37   : > { %566 = vmatpush.msrb.mxu1 %v376_v53  ;;  %472 = vmatpush.msra.mxu0 %v409_v54  ;;  %v399_v20 = vld [vmem:[#allocation2 + $0x118] sm:$0xff]  ;;  %v364_v21 = vld [vmem:[#allocation2] sm:$0xff]  ;;  %v397_v24 = vld [vmem:[#allocation2 + $0x108] sm:$0xff]  ;;  %v450_v25 = vrot.slane %v1611_v19, 1 }
  0x38   : > { %610 = vmatpush.msra.mxu3 %v381_v52  ;;  %518 = vmatpush.msra.mxu2 %v410_v55  ;;  %v678_v22 = vld [vmem:[#allocation2 + $0x320] sm:$0xff]  ;;  %v367_v23 = vld [vmem:[#allocation2 + $0x18] sm:$0xff]  ;;  %v676_v26 = vld [vmem:[#allocation2 + $0x310] sm:$0xff]  ;;  %v695_v55 = vrot.slane %v1586_v30, 2 }
  0x39   : > { %1215 = vmatmul.msk.f32.vlgmr.msrb.gmra.mxu3 %vm456_vm1, %v1576_v12  ;;  %567 = vmatpush.msrb.mxu1 %v374_v57  ;;  %v681_v27 = vld [vmem:[#allocation2 + $0x338] sm:$0xff]  ;;  %v365_v28 = vld [vmem:[#allocation2 + $0x8] sm:$0xff]  ;;  %v684_v29 = vld [vmem:[#allocation2 + $0x350] sm:$0xff]  ;;  %v451_v33 = vsel %vm443_vm0, %v445_v6, %v450_v25 }
  0x3a   : > { %611 = vmatpush.msra.mxu3 %v379_v56  ;;  %473 = vmatpush.msra.mxu0 %v407_v58  ;;  %v674_v31 = vld [vmem:[#allocation2 + $0x300] sm:$0xff]  ;;  %v679_v32 = vld [vmem:[#allocation2 + $0x328] sm:$0xff]  ;;  %v672_v34 = vld [vmem:[#allocation2 + $0x2f0] sm:$0xff] }
  0x3b   : > { %519 = vmatpush.msra.mxu2 %v408_v59  ;;  %568 = vmatpush.msrb.mxu1 %v372_v61  ;;  %v677_v35 = vld [vmem:[#allocation2 + $0x318] sm:$0xff]  ;;  %v670_v37 = vld [vmem:[#allocation2 + $0x2e0] sm:$0xff]  ;;  %v675_v38 = vld [vmem:[#allocation2 + $0x308] sm:$0xff]  ;;  %v696_v59 = vsel %vm686_vm2, %v691_v45, %v695_v55  ;;  %v687_v61 = vrot.slane %v1598_v62, 2 }
  0x3c   : > { %612 = vmatpush.msra.mxu3 %v377_v60  ;;  %474 = vmatpush.msra.mxu0 %v405_v0  ;;  %v685_v39 = vld [vmem:[#allocation2 + $0x358] sm:$0xff]  ;;  %v668_v40 = vld [vmem:[#allocation2 + $0x2d0] sm:$0xff]  ;;  %v683_v42 = vld [vmem:[#allocation2 + $0x348] sm:$0xff]  ;;  %v688_v0 = vrot.slane %v1601_v63, 2 }
  0x3d   : > { %1212 = vmatmul.msk.f32.gmra.mxu1 %vm456_vm1, %v1590_v36  ;;  %520 = vmatpush.msra.mxu2 %v406_v1  ;;  %v682_v36 = vld [vmem:[#allocation2 + $0x340] sm:$0xff]  ;;  %v673_v41 = vld [vmem:[#allocation2 + $0x2f8] sm:$0xff]  ;;  %v671_v46 = vld [vmem:[#allocation2 + $0x2e8] sm:$0xff] }
  0x3e   : > { %613 = vmatpush.msra.mxu3 %v375_v2  ;;  %569 = vmatpush.msrb.mxu1 %v370_v3  ;;  %v666_v43 = vld [vmem:[#allocation2 + $0x2c0] sm:$0xff]  ;;  %v664_v47 = vld [vmem:[#allocation2 + $0x2b0] sm:$0xff]  ;;  %v669_v48 = vld [vmem:[#allocation2 + $0x2d8] sm:$0xff] }
  0x3f   : > { %475 = vmatpush.msra.mxu0 %v403_v4  ;;  %521 = vmatpush.msra.mxu2 %v404_v7  ;;  %v662_v49 = vld [vmem:[#allocation2 + $0x2a0] sm:$0xff]  ;;  %v667_v51 = vld [vmem:[#allocation2 + $0x2c8] sm:$0xff]  ;;  %v660_v52 = vld [vmem:[#allocation2 + $0x290] sm:$0xff]  ;;  %v689_v4 = vsel %vm686_vm2, %v687_v61, %v688_v0 }
  0x40   : > { %614 = vmatpush.msra.mxu3 %v373_v8  ;;  %570 = vmatpush.msrb.mxu1 %v368_v9  ;;  %v665_v53 = vld [vmem:[#allocation2 + $0x2b8] sm:$0xff]  ;;  %v658_v54 = vld [vmem:[#allocation2 + $0x280] sm:$0xff]  ;;  %v663_v56 = vld [vmem:[#allocation2 + $0x2a8] sm:$0xff] }
  0x41   : > { %1216 = vmatmul.msk.f32.gmra.mxu3 %vm456_vm1, %v1579_v13  ;;  %476 = vmatpush.msra.mxu0 %v401_v10  ;;  %v656_v57 = vld [vmem:[#allocation2 + $0x270] sm:$0xff]  ;;  %v661_v58 = vld [vmem:[#allocation2 + $0x298] sm:$0xff]  ;;  %v659_v60 = vld [vmem:[#allocation2 + $0x288] sm:$0xff] }
  0x42   : > { %522 = vmatpush.msra.mxu2 %v402_v11  ;;  %615 = vmatpush.msra.mxu3 %v371_v14  ;;  %v652_v30 = vld [vmem:[#allocation2 + $0x250] sm:$0xff]  ;;  %v657_v1 = vld [vmem:[#allocation2 + $0x278] sm:$0xff]  ;;  %v650_v2 = vld [vmem:[#allocation2 + $0x240] sm:$0xff] }
  0x43   : > { %477 = vmatmul.f32.vlgmr.msra.gmra.mxu0 %v446_v15  ;;  %523 = vmatmul.f32.vlgmr.msra.gmra.mxu2 %v446_v15  ;;  %v655_v3 = vld [vmem:[#allocation2 + $0x268] sm:$0xff]  ;;  %v877_v8 = vld [vmem:[#allocation5 + $0x78] sm:$0xff]  ;;  %v858_v9 = vld [vmem:[#allocation5 + $0x100] sm:$0xff] }
  0x44   : > { %571 = vmatpush.msrb.mxu1 %v366_v16  ;;  %703 = vmatpush.msrb.mxu2 %v680_v17  ;;  %v859_v7 = vld [vmem:[#allocation5 + $0x108] sm:$0xff]  ;;  %v876_v10 = vld [vmem:[#allocation5 + $0x70] sm:$0xff]  ;;  %v857_v11 = vld [vmem:[#allocation5 + $0xf8] sm:$0xff] }
  0x45   : > { %616 = vmatpush.msra.mxu3 %v369_v18  ;;  %640 = vmatpush.msrb.mxu0 %v399_v20  ;;  %v875_v14 = vld [vmem:[#allocation5 + $0x68] sm:$0xff]  ;;  %v856_v16 = vld [vmem:[#allocation5 + $0xf0] sm:$0xff]  ;;  %v874_v18 = vld [vmem:[#allocation5 + $0x60] sm:$0xff] }
  0x46   : > { %572 = vmatpush.msrb.mxu1 %v364_v21  ;;  %704 = vmatpush.msrb.mxu2 %v678_v22  ;;  %v873_v20 = vld [vmem:[#allocation5 + $0x58] sm:$0xff]  ;;  %v854_v21 = vld [vmem:[#allocation5 + $0xe0] sm:$0xff]  ;;  %v872_v22 = vld [vmem:[#allocation5 + $0x50] sm:$0xff] }
  0x47   : > { %573 = vmatmul.f32.vlgmr.msrb.gmra.mxu1 %v1598_v62  ;;  %617 = vmatpush.msra.mxu3 %v367_v23  ;;  %v853_v23 = vld [vmem:[#allocation5 + $0xd8] sm:$0xff]  ;;  %v878_v25 = vld [vmem:[#allocation5 + $0x80] sm:$0xff]  ;;  %vm1223_vm4 = vmneg %vm827_vm3 }
  0x48   : > { %641 = vmatpush.msrb.mxu0 %v397_v24  ;;  %705 = vmatpush.msrb.mxu2 %v676_v26  ;;  %v879_v24 = vld [vmem:[#allocation5 + $0x88] sm:$0xff]  ;;  %v994_v44 = vld [vmem:[#allocation5 + $0x180] sm:$0xff]  ;;  %v845_v55 = vld [vmem:[#allocation5 + $0x98] sm:$0xff] }
  0x49   : > { %618 = vmatpush.msra.mxu3 %v365_v28  ;;  %740 = vmatpush.msra.mxu1 %v684_v29  ;;  %v871_v26 = vld [vmem:[#allocation5 + $0x48] sm:$0xff]  ;;  %v997_v29 = vld [vmem:[#allocation5 + $0x198] sm:$0xff]  ;;  %v866_v45 = vld [vmem:[#allocation5 + $0x20] sm:$0xff] }
  0x4a   : > { %749 = vmatpush.msra.mxu0 %v681_v27  ;;  %619 = vmatmul.f32.vlgmr.msra.gmra.mxu3 %v1598_v62  ;;  %v651_v62 = vld [vmem:[#allocation2 + $0x248] sm:$0xff]  ;;  %v852_v27 = vld [vmem:[#allocation5 + $0xd0] sm:$0xff] }
  0x4b   : > { %706 = vmatpush.msrb.mxu2 %v674_v31  ;;  %480 = vmatmul.f32.gmra.mxu0 %v451_v33  ;;  %v870_v31 = vld [vmem:[#allocation5 + $0x40] sm:$0xff] }
  0x4c   : > { %750 = vmatpush.msra.mxu0 %v679_v32  ;;  %526 = vmatmul.f32.gmra.mxu2 %v451_v33  ;;  %v851_v32 = vld [vmem:[#allocation5 + $0xc8] sm:$0xff] }
  0x4d   : > { %707 = vmatpush.msrb.mxu2 %v672_v34  ;;  %741 = vmatpush.msra.mxu1 %v682_v36  ;;  %v850_v36 = vld [vmem:[#allocation5 + $0xc0] sm:$0xff] }
  0x4e   : > { %751 = vmatpush.msra.mxu0 %v677_v35  ;;  %885 = vmatpush.msrb.mxu3 %v877_v8  ;;  %v869_v35 = vld [vmem:[#allocation5 + $0x38] sm:$0xff]  ;;  %v984_v8 = vld [vmem:[#allocation5 + $0x130] sm:$0xff] }
  0x4f   : > { %708 = vmatpush.msrb.mxu2 %v670_v37  ;;  %576 = vmatmul.f32.gmra.mxu1 %v1601_v63  ;;  %v996_v37 = vld [vmem:[#allocation5 + $0x190] sm:$0xff] }
  0x50   : > { %752 = vmatpush.msra.mxu0 %v675_v38  ;;  %786 = vmatpush.msrb.mxu1 %v685_v39  ;;  %v868_v38 = vld [vmem:[#allocation5 + $0x30] sm:$0xff]  ;;  %v849_v39 = vld [vmem:[#allocation5 + $0xb8] sm:$0xff] }
  0x51   : > { %709 = vmatpush.msrb.mxu2 %v668_v40  ;;  %886 = vmatpush.msrb.mxu3 %v876_v10  ;;  %v995_v40 = vld [vmem:[#allocation5 + $0x188] sm:$0xff] }
  0x52   : > { %753 = vmatpush.msra.mxu0 %v673_v41  ;;  %787 = vmatpush.msrb.mxu1 %v683_v42  ;;  %v867_v41 = vld [vmem:[#allocation5 + $0x28] sm:$0xff]  ;;  %v848_v42 = vld [vmem:[#allocation5 + $0xb0] sm:$0xff] }
  0x53   : > { %622 = vmatmul.f32.gmra.mxu3 %v1601_v63  ;;  %710 = vmatpush.msrb.mxu2 %v666_v43  ;;  %v693_v63 = vrot.slane %v1611_v19, 2  ;;  %v855_v19 = vld [vmem:[#allocation5 + $0xe8] sm:$0xff] }
  0x54   : > { %754 = vmatpush.msra.mxu0 %v671_v46  ;;  %887 = vmatpush.msrb.mxu3 %v875_v14  ;;  %v847_v46 = vld [vmem:[#allocation5 + $0xa8] sm:$0xff] }
  0x55   : > { %1217 = vmatmul.msk.f32.vlgmr.msrb.gmra.mxu0 %vm456_vm1, %v1576_v12  ;;  %711 = vmatpush.msrb.mxu2 %v664_v47  ;;  %v654_v12 = vld [vmem:[#allocation2 + $0x260] sm:$0xff]  ;;  %v694_v5 = vsel %vm686_vm2, %v688_v0, %v693_v63  ;;  %v983_v10 = vld [vmem:[#allocation5 + $0x128] sm:$0xff] }
  0x56   : > { %755 = vmatpush.msra.mxu0 %v669_v48  ;;  %888 = vmatpush.msrb.mxu3 %v874_v18  ;;  %v982_v18 = vld [vmem:[#allocation5 + $0x120] sm:$0xff] }
  0x57   : > { %712 = vmatpush.msrb.mxu2 %v662_v49  ;;  %1219 = vmatmul.msk.f32.vlgmr.msra.gmra.mxu1 %vm456_vm1, %v692_v50  ;;  %v993_v49 = vld [vmem:[#allocation5 + $0x178] sm:$0xff] }
  0x58   : > { %756 = vmatpush.msra.mxu0 %v667_v51  ;;  %935 = vmatpush.msra.mxu1 %v859_v7  ;;  %v846_v51 = vld [vmem:[#allocation5 + $0xa0] sm:$0xff] }
  0x59   : > { %713 = vmatpush.msrb.mxu2 %v660_v52  ;;  %889 = vmatpush.msrb.mxu3 %v873_v20  ;;  %v861_v52 = vld [vmem:[#allocation5 + $0x118] sm:$0xff]  ;;  %v998_v7 = vld [vmem:[#allocation5 + $0x1a0] sm:$0xff] }
  0x5a   : > { %757 = vmatpush.msra.mxu0 %v665_v53  ;;  %936 = vmatpush.msra.mxu1 %v858_v9  ;;  %v992_v53 = vld [vmem:[#allocation5 + $0x170] sm:$0xff] }
  0x5b   : > { %714 = vmatpush.msrb.mxu2 %v658_v54  ;;  %890 = vmatpush.msrb.mxu3 %v872_v22  ;;  %v864_v54 = vld [vmem:[#allocation5 + $0x10] sm:$0xff]  ;;  %v799_v22 = vld [vmem:[%s1732_s3] sm:$0x3] }
  0x5c   : > { %758 = vmatpush.msra.mxu0 %v663_v56  ;;  %937 = vmatpush.msra.mxu1 %v857_v11  ;;  %v860_v56 = vld [vmem:[#allocation5 + $0x110] sm:$0xff] }
  0x5d   : > { %1218 = vmatmul.msk.f32.gmra.mxu0 %vm456_vm1, %v1579_v13  ;;  %715 = vmatpush.msrb.mxu2 %v656_v57  ;;  %v653_v13 = vld [vmem:[#allocation2 + $0x258] sm:$0xff]  ;;  %v991_v57 = vld [vmem:[#allocation5 + $0x168] sm:$0xff] }
  0x5e   : > { %759 = vmatpush.msra.mxu0 %v661_v58  ;;  %938 = vmatpush.msra.mxu1 %v856_v16  ;;  %v863_v58 = vld [vmem:[#allocation5 + $0x8] sm:$0xff] }
  0x5f   : > { %716 = vmatpush.msrb.mxu2 %v654_v12  ;;  %1220 = vmatmul.msk.f32.gmra.mxu1 %vm456_vm1, %v696_v59  ;;  %v844_v12 = vld [vmem:[#allocation5 + $0x90] sm:$0xff] }
  0x60   : > { %760 = vmatpush.msra.mxu0 %v659_v60  ;;  %939 = vmatpush.msra.mxu1 %v855_v19  ;;  %v862_v60 = vld [vmem:[#allocation5] sm:$0xff] }
  0x61   : > { %717 = vmatpush.msrb.mxu2 %v652_v30  ;;  %891 = vmatpush.msrb.mxu3 %v871_v26  ;;  %v989_v30 = vld [vmem:[#allocation5 + $0x158] sm:$0xff] }
  0x62   : > { %761 = vmatpush.msra.mxu0 %v657_v1  ;;  %940 = vmatpush.msra.mxu1 %v854_v21  ;;  %v999_v1 = vld [vmem:[#allocation5 + $0x1a8] sm:$0xff] }
  0x63   : > { %718 = vmatpush.msrb.mxu2 %v650_v2  ;;  %892 = vmatpush.msrb.mxu3 %v870_v31 }
  0x64   : > { %762 = vmatpush.msra.mxu0 %v655_v3  ;;  %719 = vmatmul.f32.vlgmr.msrb.gmra.mxu2 %v689_v4  ;;  %v988_v3 = vld [vmem:[#allocation5 + $0x150] sm:$0xff] }
  0x65   : > { %922 = vmatpush.msra.mxu2 %v879_v24  ;;  %941 = vmatpush.msra.mxu1 %v853_v23 }
  0x66   : > { %763 = vmatpush.msra.mxu0 %v653_v13  ;;  %893 = vmatpush.msrb.mxu3 %v869_v35  ;;  %v987_v13 = vld [vmem:[#allocation5 + $0x148] sm:$0xff] }
  0x67   : > { %1221 = vmatmul.msk.f32.vlgmr.msrb.gmra.mxu1 %vm456_vm1, %v692_v50  ;;  %923 = vmatpush.msra.mxu2 %v878_v25  ;;  %v865_v50 = vld [vmem:[#allocation5 + $0x18] sm:$0xff]  ;;  %v809_v25 = vld [vmem:[%s1733_s4] sm:$0x3] }
  0x68   : > { %764 = vmatpush.msra.mxu0 %v651_v62  ;;  %942 = vmatpush.msra.mxu1 %v852_v27  ;;  %v986_v62 = vld [vmem:[#allocation5 + $0x140] sm:$0xff]  ;;  %v802_v27 = vperm.slane %v799_v22, 1  ;;  %v812_v35 = vperm.slane %v809_v25, 1 }
  0x69   : > { %765 = vmatmul.f32.vlgmr.msra.gmra.mxu0 %v689_v4  ;;  %1019 = vmatpush.msrb.mxu2 %v997_v29 }
  0x6a   : > { %943 = vmatpush.msra.mxu1 %v851_v32  ;;  %894 = vmatpush.msrb.mxu3 %v868_v38  ;;  %v801_v32 = vperm.slane %v799_v22, 0  ;;  %v811_v38 = vperm.slane %v809_v25, 0 }
  0x6b   : > { %1020 = vmatpush.msrb.mxu2 %v996_v37  ;;  %972 = vmatpush.msrb.mxu0 %v861_v52 }
  0x6c   : > { %722 = vmatmul.f32.gmra.mxu2 %v694_v5  ;;  %944 = vmatpush.msra.mxu1 %v850_v36 }
  0x6d   : > { %1021 = vmatpush.msrb.mxu2 %v995_v40  ;;  %895 = vmatpush.msrb.mxu3 %v867_v41 }
  0x6e   : > { %945 = vmatpush.msra.mxu1 %v849_v39  ;;  %973 = vmatpush.msrb.mxu0 %v860_v56 }
  0x6f   : > { %1222 = vmatmul.msk.f32.gmra.mxu1 %vm456_vm1, %v696_v59  ;;  %1022 = vmatpush.msrb.mxu2 %v994_v44  ;;  %v990_v59 = vld [vmem:[#allocation5 + $0x160] sm:$0xff] }
  0x70   : > { %946 = vmatpush.msra.mxu1 %v848_v42  ;;  %896 = vmatpush.msrb.mxu3 %v866_v45 }
  0x71   : > { %768 = vmatmul.f32.gmra.mxu0 %v694_v5  ;;  %1023 = vmatpush.msrb.mxu2 %v993_v49  ;;  %v985_v5 = vld [vmem:[#allocation5 + $0x138] sm:$0xff] }
  0x72   : > { %947 = vmatpush.msra.mxu1 %v847_v46  ;;  %897 = vmatpush.msrb.mxu3 %v865_v50 }
  0x73   : > { %1024 = vmatpush.msrb.mxu2 %v992_v53 }
  0x74   : > { %948 = vmatpush.msra.mxu1 %v846_v51  ;;  %898 = vmatpush.msrb.mxu3 %v864_v54 }
  0x75   : > { %1025 = vmatpush.msrb.mxu2 %v991_v57 }
  0x76   : > { %949 = vmatpush.msra.mxu1 %v845_v55  ;;  %899 = vmatpush.msrb.mxu3 %v863_v58 }
  0x77   : > { %1026 = vmatpush.msrb.mxu2 %v990_v59 }
  0x78   : > { %950 = vmatpush.msra.mxu1 %v844_v12  ;;  %900 = vmatpush.msrb.mxu3 %v862_v60 }
  0x79   : > { %1027 = vmatpush.msrb.mxu2 %v989_v30 }
  0x7a   : > { %1056 = vmatpush.msra.mxu3 %v999_v1 }
  0x7b   : > { %1028 = vmatpush.msrb.mxu2 %v988_v3 }
  0x7c   : > { %1057 = vmatpush.msra.mxu3 %v998_v7 }
  0x7d   : > { %1029 = vmatpush.msrb.mxu2 %v987_v13 }
  0x7f   : > { %1030 = vmatpush.msrb.mxu2 %v986_v62 }
  0x81   : > { %1031 = vmatpush.msrb.mxu2 %v985_v5 }
  0x83   : > { %1032 = vmatpush.msrb.mxu2 %v984_v8 }
  0x85   : > { %1033 = vmatpush.msrb.mxu2 %v983_v10 }
  0x87   : > { %1034 = vmatpush.msrb.mxu2 %v982_v18 }
  0xac   : > { %v1639_v15 = vpop.f32.mrf.mxu3 }
  0xb0   : > { %v1637_v6 = vpop.f32.mrf.mxu1 }
  0xb4   : > { %v1645_v33 = vpop.f32.mrf.mxu3 }
  0xba   : > { %v1641_v17 = vpop.f32.mrf.mxu1 }
  0xbc   : > { %v1651_v47 = vpop.f32.mrf.mxu3 }
  0xc0   : > { %v1643_v28 = vpop.f32.mrf.mxu0 }
  0xc1   : > { %v502_v14 = vadd.f32 %v1637_v6, %v1643_v28 }
  0xc4   : > { %v1647_v34 = vpop.f32.mrf.mxu1  ;;  %v600_v4 = vpop.f32.mrf.mxu3 }
  0xc5   : > { %v575_v20 = vadd.f32 %v1647_v34, %v502_v14 }
  0xc6   : > { %v524_v2 = vpop.f32.mrf.mxu2 }
  0xc7   : > { %v548_v19 = vadd.f32 %v1639_v15, %v524_v2  ;;  %v598_v15 = vadd.f32 %v1651_v47, %v575_v20 }
  0xc8   : > { %v1649_v43 = vpop.f32.mrf.mxu0 }
  0xc9   : > { %v505_v29 = vadd.f32 %v1641_v17, %v1649_v43 }
  0xcc   : > { %v1653_v48 = vpop.f32.mrf.mxu1 }
  0xcd   : > { %v620_v16 = vpop.f32.mrf.mxu3  ;;  %v578_v41 = vadd.f32 %v1653_v48, %v505_v29 }
  0xce   : > { %v621_v23 = vadd.f32 %v620_v16, %v548_v19 }
  0xcf   : > { %v527_v11 = vpop.f32.mrf.mxu2  ;;  %v601_v52 = vadd.f32 %v600_v4, %v578_v41 }
  0xd0   : > { %v551_v39 = vadd.f32 %v1645_v33, %v527_v11 }
  0xd2   : > { %v643_v61 = vpop.f32.mrf.mxu0 }
  0xd3   : > { %v644_v6 = vadd.f32 %v643_v61, %v621_v23 }
  0xd4   : > { %v743_v0 = vpop.f32.mrf.mxu1 }
  0xd6   : > { %v623_v36 = vpop.f32.mrf.mxu3 }
  0xd7   : > { %v624_v45 = vadd.f32 %v623_v36, %v551_v39 }
  0xda   : > { %v646_v9 = vpop.f32.mrf.mxu0 }
  0xdb   : > { %v647_v17 = vadd.f32 %v646_v9, %v624_v45 }
  0xdc   : > { %v746_v63 = vpop.f32.mrf.mxu1 }
  0xe4   : > { %v789_v21 = vpop.f32.mrf.mxu1 }
  0xe6   : > { %v766_v24 = vpop.f32.mrf.mxu0 }
  0xe7   : > { %v790_v26 = vadd.f32 %v789_v21, %v766_v24  ;;  %v720_v28 = vpop.f32.mrf.mxu2 }
  0xe8   : > { %v744_v31 = vadd.f32 %v743_v0, %v720_v28 }
  0xe9   : > { %v796_v34 = vadd.f32 %v790_v26, %v644_v6 }
  0xea   : > { %v795_v37 = vadd.f32 %v744_v31, %v598_v15  ;;  %v1305_v31 = vld [vmem:[%s1735_s6] ss:$0 sm:$0xff] }
  0xeb   : > { %v806_v40 = vmul.f32 %v802_v27, %v796_v34  ;;  %v1306_v34 = vld [vmem:[%s1736_s7] ss:$0 sm:$0xff] }
  0xec   : > { %v805_v42 = vmul.f32 %v801_v32, %v795_v37  ;;  %v792_v44 = vpop.f32.mrf.mxu1 }
  0xed   : > { %v816_v46 = vadd.f32 %v812_v35, %v806_v40 }
  0xee   : > { %v815_v47 = vadd.f32 %v811_v38, %v805_v42  ;;  %v769_v49 = vpop.f32.mrf.mxu0 }
  0xef   : > { %v820_v43 = vmax.f32 %v816_v46, 0.0  ;;  %v793_v50 = vadd.f32 %v792_v44, %v769_v49  ;;  %v723_v51 = vpop.f32.mrf.mxu2 }
  0xf0   : > { %v819_v53 = vmax.f32 %v815_v47, 0.0  ;;  %v747_v54 = vadd.f32 %v746_v63, %v723_v51 }
  0xf1   : > { %v798_v55 = vadd.f32 %v793_v50, %v647_v17  ;;  %1227 = vmatmul.msk.f32.vlgmr.msrb.gmra.mxu0 %vm456_vm1, %v820_v43  ;;  %v829_v33 = vrot.slane %v820_v43, 7  ;;  %v1080_v43 = vld [vmem:[%s357_s21 + $0x8] sm:$0xff] }
  0xf2   : > { %v828_v48 = vrot.slane %v819_v53, 7  ;;  %v797_v56 = vadd.f32 %v747_v54, %v601_v52  ;;  %951 = vmatmul.f32.vlgmr.msra.gmra.mxu1 %v819_v53 }
  0xf3   : > { %v808_v57 = vmul.f32 %v802_v27, %v798_v55  ;;  %v840_v58 = vsel %vm827_vm3, 0.0, %v829_v33 }
  0xf4   : > { %1225 = vmatmul.msk.f32.vlgmr.msra.gmra.mxu2 %vm456_vm1, %v840_v58  ;;  %1224 = vmatmul.msk.f32.vlgmr.msrb.gmra.mxu3 %vm1223_vm4, %v828_v48  ;;  %v807_v12 = vmul.f32 %v801_v32, %v797_v56  ;;  %v839_v4 = vsel %vm827_vm3, 0.0, %v828_v48  ;;  %v1006_v5 = vrot.slane %v840_v58, 2 }
  0xf5   : > { %v818_v59 = vadd.f32 %v812_v35, %v808_v57  ;;  %v1003_v63 = vrot.slane %v839_v4, 2 }
  0xf6   : > { %v817_v60 = vadd.f32 %v811_v38, %v807_v12  ;;  %v1079_v38 = vld [vmem:[%s357_s21] sm:$0xff]  ;;  %s1387_s21 = scalar_lea.hbm %s1737_s8, 32 }
  0xf7   : > { %v822_v61 = vmax.f32 %v818_v59, 0.0  ;;  %p1389_p4 = scmp.lt.s32.totalorder %s1387_s21, %s1383_s22 }
  0xf8   : > { %v821_v0 = vmax.f32 %v817_v60, 0.0 }
  0xf9   : > { %v832_v30 = vrot.slane %v822_v61, 7  ;;  %1228 = vmatmul.msk.f32.gmra.mxu0 %vm456_vm1, %v822_v61  ;;  %p1390_p7 = por %p1389_p4, %p1388_p3 }
  0xfa   : > { %v830_v1 = vrot.slane %v821_v0, 7  ;;  %954 = vmatmul.f32.gmra.mxu1 %v821_v0 }
  0xfb   : > { %v833_v2 = vsel %vm827_vm3, %v829_v33, %v832_v30  ;;  %v842_v10 = vsel %vm827_vm3, %v832_v30, 0.0  ;;  %p1391_p8 = pnand %p1390_p7, %p1386_p2 }
  0xfc   : > { %1226 = vmatmul.msk.f32.gmra.mxu2 %vm456_vm1, %v833_v2  ;;  %v831_v3 = vsel %vm827_vm3, %v828_v48, %v830_v1  ;;  %v1007_v62 = vrot.slane %v833_v2, 2  ;;  %v841_v9 = vsel %vm827_vm3, %v830_v1, 0.0  ;;  %v1011_v14 = vrot.slane %v842_v10, 2 }
  0xfd   : > { %904 = vmatmul.f32.gmra.mxu3 %v831_v3  ;;  %v1004_v13 = vrot.slane %v831_v3, 2  ;;  %v1009_v11 = vrot.slane %v841_v9, 2 }
  0xfe   : > { %v1008_v8 = vsel %vm686_vm2, %v1006_v5, %v1007_v62  ;;  %v1012_v18 = vsel %vm686_vm2, %v1007_v62, %v1011_v14 }
  0xff   : > { %v1005_v7 = vsel %vm686_vm2, %v1003_v63, %v1004_v13  ;;  %v1010_v16 = vsel %vm686_vm2, %v1004_v13, %v1009_v11 }
 0x104   : > { %1035 = vmatmul.f32.vlgmr.msrb.gmra.mxu2 %v1005_v7 }
 0x105   : > { %1229 = vmatmul.msk.f32.vlgmr.msra.gmra.mxu3 %vm456_vm1, %v1008_v8 }
 0x10c   : > { %1038 = vmatmul.f32.gmra.mxu2 %v1010_v16 }
 0x10d   : > { %1230 = vmatmul.msk.f32.gmra.mxu3 %vm456_vm1, %v1012_v18 }
 0x16e   : > { %v975_v25 = vpop.f32.mrf.mxu0 }
 0x16f   : > { %v952_v24 = vpop.f32.mrf.mxu1 }
 0x176   : > { %v978_v39 = vpop.f32.mrf.mxu0 }
 0x177   : > { %v925_v19 = vpop.f32.mrf.mxu2  ;;  %v902_v20 = vpop.f32.mrf.mxu3 }
 0x178   : > { %v926_v23 = vadd.f32 %v925_v19, %v902_v20  ;;  %v955_v35 = vpop.f32.mrf.mxu1 }
 0x17a   : > { %v953_v6 = vadd.f32 %v952_v24, %v926_v23 }
 0x17c   : > { %v976_v15 = vadd.f32 %v975_v25, %v953_v6 }
 0x17f   : > { %v928_v21 = vpop.f32.mrf.mxu2 }
 0x180   : > { %v905_v22 = vpop.f32.mrf.mxu3 }
 0x181   : > { %v929_v28 = vadd.f32 %v928_v21, %v905_v22 }
 0x183   : > { %v956_v36 = vadd.f32 %v955_v35, %v929_v28 }
 0x185   : > { %v979_v45 = vadd.f32 %v978_v39, %v956_v36 }
 0x187   : > { %v1036_v26 = vpop.f32.mrf.mxu2 }
 0x188   : > { %v1059_v27 = vpop.f32.mrf.mxu3 }
 0x189   : > { %v1060_v29 = vadd.f32 %v1059_v27, %v1036_v26 }
 0x18b   : > { %v1065_v32 = vadd.f32 %v1060_v29, %v976_v15 }
 0x18d   : > { %v1071_v37 = vmul.f32 %v1305_v31, %v1065_v32 }
 0x18f   : > { %v1077_v40 = vadd.f32 %v1306_v34, %v1071_v37  ;;  %v1039_v41 = vpop.f32.mrf.mxu2 }
 0x190   : > { %v1062_v42 = vpop.f32.mrf.mxu3 }
 0x191   : > { %v1081_v44 = vadd.f32 %v1079_v38, %v1077_v40  ;;  %v1063_v46 = vadd.f32 %v1062_v42, %v1039_v41 }
 0x193   : > { %v1083_v47 = vmax.f32 %v1081_v44, 0.0  ;;  %v1066_v49 = vadd.f32 %v1063_v46, %v979_v45 }
 0x195   : > { %1085 = vst [vmem:[%s347_s13] sm:$0xff] %v1083_v47  ;;  %v1072_v17 = vmul.f32 %v1305_v31, %v1066_v49 }
 0x197   : > { %v1078_v50 = vadd.f32 %v1306_v34, %v1072_v17 }
 0x199   : > { %v1082_v51 = vadd.f32 %v1080_v43, %v1078_v50 }
 0x19b   : > { %v1084_v52 = vmax.f32 %v1082_v51, 0.0 }
 0x19d   : > { %1086 = vst [vmem:[%s347_s13 + $0x8] sm:$0xff] %v1084_v52 }
 0x19e   : > { %1394 = shalt.err (!%p1391_p8)
}
 0x19f   : > { %s1445_s20 = smov 128   ;;  %s1446_s10 = smov 8  }
 0x1a0   : > { %1247 = dma.vmem_to_hbm [thread:$0]  (%p1530_p5), %s1101_s18, 256, %s1103_s19, %s1088_s9, %s1445_s20, %s1445_s20, %s1446_s10  }
 0x1a1 PF: > { %p1264_p9 = scmp.ge.s32.totalorder %s1437_s30, 2  ;;  %s1117_s12 = sand.u32 1, %s1425_s27  }
 0x1a2   : > { %s1118_s13 = scalar_lea.sflag [#allocation4], %s1117_s12 }
 0x1a3   : > { %p1257_p10 = pnand %p1264_p9, %p1534_p6 }
 0x1a5   : > { %p1258_p11 = pneg %p1257_p10 }
 0x1a7   : > { %1420 = dma.done.wait (%p1258_p11), %s1118_s13, 256  }
 0x1a8   : > { %1422 = vsyncadd (%p1258_p11), %s1118_s13, 4294967040  ;;  %p20_p12 = scmp.ge.s32.totalorder %s1517_s11, 4   ;;  %s1741_s27 = smov %s1429_s28 }
 0x1a9   : > { %s1742_s28 = smov %s1433_s29  ;;  %s1743_s29 = smov %s1528_s14 }
 0x1aa   : > { %s1744_s30 = smov %s1517_s11  ;;  %22 = sbr.rel (!%p20_p12) target bundleno = 5 (0x5), region = 103 }
 0x1af   :  { %1124 = vsyncpa [#allocation3], 1 }
 0x1b0   :  { %1126 = vsyncpa [#allocation3 + $0x1], 1 }
 0x1b1   :  { %1127 = vsyncpa [#allocation6], 1 }
 0x1b2   :  { %1128 = vsyncpa [#allocation4], 1 }
 0x1b3   :  { %1130 = vsyncpa [#allocation4 + $0x1], 1 }

</bundles_post_ra>
